<compile_context>
chip_gen: v7x
topology: tpu7x:2x2x1
jax: 0.10.0
libtpu: 0.0.40
codegen_flags: <defaults>
</compile_context>

<pallas_src>
import jax
import jax.numpy as jnp
from jax import lax
from jax.experimental import pallas as pl
from jax.experimental.pallas import tpu as pltpu

_SUBLANES = 8
_LANES_MAX = 512


def _tpu_generation_params():
    """Return (tensorcores_per_chip, per-input block bytes), conservatively."""
    cores = 1
    block_bytes = 8 * 1024 * 1024          # comfortable inside 128 MiB VMEM (v5e/v6e)
    try:
        info = pltpu.get_tpu_info()
        vmem = getattr(info, "vmem_capacity_bytes", None)
        if vmem is not None and 0 < int(vmem) <= 96 * 1024 * 1024:
            block_bytes = 6 * 1024 * 1024  # v7x: 64 MiB VMEM -> keep headroom
        for name in ("num_tensorcores", "tensorcores_per_chip", "num_cores",
                     "cores_per_chip", "core_count"):
            v = getattr(info, name, None)
            if v is not None and int(v) > 0:
                cores = int(v)
                break
    except Exception:
        pass
    if cores <= 1:
        try:
            kind = jax.devices()[0].device_kind.lower()
            if "v7" in kind or "7x" in kind:
                cores = 2
        except Exception:
            pass
    return max(1, min(int(cores), 2)), block_bytes


def _partial_group_sums(x3, t3):
    """Per-core partial sums of (x - t) over a (n_groups, 8, lanes) slab."""
    n_groups, subl, lanes = x3.shape
    group = subl * lanes
    itemsize = max(jnp.dtype(x3.dtype).itemsize, jnp.dtype(t3.dtype).itemsize)

    n_tc, block_bytes = _tpu_generation_params()
    n_cores = n_tc if n_groups >= 2 else 1

    chunk_max = max(1, block_bytes // (group * itemsize))
    gpc = pl.cdiv(n_groups, n_cores)          # groups per core
    chunk = min(chunk_max, gpc)
    sub = min(8, chunk)                       # rows per inner iteration
    chunk = (chunk // sub) * sub              # keep chunk a multiple of sub
    steps = pl.cdiv(gpc, chunk)
    n_sub = chunk // sub
    n_blocks = pl.cdiv(n_groups, chunk)       # valid block indices: [0, n_blocks)
    inner_unroll = True if n_sub <= 8 else 4

    def kernel(x_ref, t_ref, o_ref):
        s = pl.program_id(1)

        @pl.when(s == 0)
        def _init():
            o_ref[...] = jnp.zeros_like(o_ref)

        # UNclamped global index of this block's first group; rows at/after
        # n_groups (ragged last block or clamped duplicate boundary blocks)
        # contribute zero via the mask below.
        start = (pl.program_id(0) * steps + s) * chunk
        rows_left = n_groups - start
        row_iota = lax.broadcasted_iota(jnp.int32, (sub, subl, lanes), 0)

        def body(j, acc):
            base = pl.multiple_of(j * sub, sub)
            d = (x_ref[pl.ds(base, sub)].astype(jnp.float32)
                 - t_ref[pl.ds(base, sub)].astype(jnp.float32))
            d = jnp.where(row_iota < rows_left - base, d, 0.0)
            return acc + jnp.sum(d, axis=0)

        acc = lax.fori_loop(0, n_sub, body,
                            jnp.zeros((subl, lanes), jnp.float32),
                            unroll=inner_unroll)
        o_ref[...] += acc

    # Clamp so boundary grid steps never request a fully out-of-bounds block;
    # their contribution is zeroed by the in-kernel row mask.
    def in_map(p, s):
        return (jnp.minimum(p * steps + s, n_blocks - 1), 0, 0)

    block_in_bytes = chunk * group * itemsize
    vmem_limit = int(min(100 << 20, max(32 << 20, 4 * block_in_bytes + (4 << 20))))

    cost = pl.CostEstimate(
        flops=2 * n_groups * group,
        transcendentals=0,
        bytes_accessed=2 * n_groups * group * itemsize + n_cores * group * 4,
    )

    return pl.pallas_call(
        kernel,
        out_shape=jax.ShapeDtypeStruct((n_cores, subl, lanes), jnp.float32),
        grid_spec=pltpu.PrefetchScalarGridSpec(
            num_scalar_prefetch=0,
            grid=(n_cores, steps),
            in_specs=[
                pl.BlockSpec((chunk, subl, lanes), in_map),
                pl.BlockSpec((chunk, subl, lanes), in_map),
            ],
            out_specs=pl.BlockSpec((None, subl, lanes), lambda p, s: (p, 0, 0)),
        ),
        compiler_params=pltpu.CompilerParams(
            dimension_semantics=("parallel", "arbitrary"),
            vmem_limit_bytes=vmem_limit,
        ),
        cost_estimate=cost,
    )(x3, t3)


def _pick_lanes(total):
    lanes = _LANES_MAX
    while lanes > 128 and total < _SUBLANES * lanes:
        lanes //= 2
    return lanes


def multi_task_loss(inp, tgt):
    """y = (sum(inp - tgt))^2 / (inp.shape[0] * inp.shape[1])   (scalar f32)."""
    assert inp.shape == tgt.shape
    assert inp.ndim >= 2
    denom = jnp.float32(inp.shape[0] * inp.shape[1])

    total = 1
    for d in inp.shape:
        total *= d

    x_flat = inp.reshape(-1)          # free (contiguous)
    t_flat = tgt.reshape(-1)

    lanes = _pick_lanes(total)
    group = _SUBLANES * lanes
    n_groups = total // group
    rem = total - n_groups * group

    total_sum = jnp.float32(0.0)

    if rem:
        # Tiny (< one group, <=16 KiB) tail summed in plain JAX.
        xt = x_flat[n_groups * group:].astype(jnp.float32)
        tt = t_flat[n_groups * group:].astype(jnp.float32)
        total_sum = total_sum + jnp.sum(xt - tt)

    if n_groups > 0:
        if rem:
            # TODO(synk): a fully copy-free ragged path would need a manual-DMA
            # (memory_space=pl.ANY) 1-D variant; this prefix slice may copy the
            # aligned prefix once, but aligned totals stay zero-copy and nothing
            # is ever padded.
            x_main = x_flat[:n_groups * group]
            t_main = t_flat[:n_groups * group]
        else:
            x_main, t_main = x_flat, t_flat
        x3 = x_main.reshape(n_groups, _SUBLANES, lanes)
        t3 = t_main.reshape(n_groups, _SUBLANES, lanes)
        total_sum = total_sum + jnp.sum(_partial_group_sums(x3, t3))

    return (total_sum * total_sum) / denom


if __name__ == "__main__":
    key = jax.random.PRNGKey(0)
    keys = jax.random.split(key, 10)

    def ref_loss(x, t):
        return jnp.square(jnp.sum(x.astype(jnp.float32) - t.astype(jnp.float32))) / (
            x.shape[0] * x.shape[1])

    def check(kx, kt, shape, dtype=jnp.float32):
        x = jax.random.normal(kx, shape, dtype=dtype)
        t = jax.random.normal(kt, shape, dtype=dtype)
        y = jax.block_until_ready(multi_task_loss(x, t))
        r = ref_loss(x, t)
        assert jnp.allclose(y, r, rtol=1e-4, atol=1e-3), (shape, dtype, y, r)

    # Small NCHW shape from the module's forward (kernel path, 256-lane slab).
    check(keys[0], keys[1], (2, 4, 16, 16))
    # Aligned multi-group case: 10 groups of 4096 -> multi-step grid with a
    # masked ragged last block (chunk=8, groups 8..9 valid in block 1).
    check(keys[2], keys[3], (2, 4, 64, 80))
    # Awkward tiny ragged shape: plain-JAX tail-only path.
    check(keys[4], keys[5], (2, 3, 7, 5))
    # Ragged-but-larger: aligned-prefix kernel + plain-JAX tail (2*4*33*33 = 8712).
    check(keys[6], keys[7], (2, 4, 33, 33))
    # bf16 inputs streamed directly (kernel upcasts to f32).
    check(keys[8], keys[9], (2, 4, 64, 80), dtype=jnp.bfloat16)

    print("KERNEL_OK")
</pallas_src>

<mosaic_0001>
module attributes {stable_mosaic.version = 11 : i64} {
  func.func @kernel(%arg0: i32, %arg1: i32, %arg2: memref<1x8x256xf32, #tpu.memory_space<vmem>>, %arg3: memref<1x8x256xf32, #tpu.memory_space<vmem>>, %arg4: memref<1x8x256xf32, #tpu.memory_space<vmem>>) attributes {dimension_semantics = [#tpu.dimension_semantics<parallel>, #tpu.dimension_semantics<arbitrary>], iteration_bounds = array<i64: 1, 1>, scalar_prefetch = 0 : i64, scratch_operands = 0 : i64, tpu.core_type = #tpu.core_type<tc>, window_params = [{transform_indices = @transform_0, window_bounds = array<i64: 1, 8, 256>}, {transform_indices = @transform_1, window_bounds = array<i64: 1, 8, 256>}, {transform_indices = @transform_2, window_bounds = array<i64: 1, 8, 256>}]} {
    %c0_i32 = arith.constant 0 : i32
    %0 = arith.cmpi eq, %arg1, %c0_i32 : i32
    %1 = arith.extui %0 : i1 to i32
    %c0_i32_0 = arith.constant 0 : i32
    %2 = arith.cmpi ne, %1, %c0_i32_0 : i32
    scf.if %2 {
      %cst_17 = arith.constant 0.000000e+00 : f32
      %29 = vector.broadcast %cst_17 : f32 to vector<8x256xf32>
      %c0_18 = arith.constant 0 : index
      %c0_19 = arith.constant 0 : index
      %c0_20 = arith.constant 0 : index
      %30 = vector.load %arg4[%c0_18, %c0_19, %c0_20] : memref<1x8x256xf32, #tpu.memory_space<vmem>>, vector<1x8x256xf32>
      %31 = vector.shape_cast %30 : vector<1x8x256xf32> to vector<8x256xf32>
      %32 = vector.shape_cast %29 : vector<8x256xf32> to vector<1x8x256xf32>
      tpu.vector_store %arg4[%c0_18, %c0_19, %c0_20], %32 {strides = array<i32>} : memref<1x8x256xf32, #tpu.memory_space<vmem>>, vector<1x8x256xf32>,
    } else {
    }
    %c1_i32 = arith.constant 1 : i32
    %3 = arith.muli %arg0, %c1_i32 : i32
    %4 = arith.addi %3, %arg1 : i32
    %c1_i32_1 = arith.constant 1 : i32
    %5 = arith.muli %4, %c1_i32_1 : i32
    %c1_i32_2 = arith.constant 1 : i32
    %6 = arith.subi %c1_i32_2, %5 : i32
    %7 = tpu.iota {dimensions = array<i32: 0>} : vector<1x8x256xi32>
    %cst = arith.constant 0.000000e+00 : f32
    %8 = vector.broadcast %cst : f32 to vector<8x256xf32>
    %c0_i32_3 = arith.constant 0 : i32
    %c1_i32_4 = arith.constant 1 : i32
    %9 = arith.muli %c0_i32_3, %c1_i32_4 : i32
    %10 = tpu.assume_multiple %9, 1 : i32
    %11 = arith.index_cast %10 : i32 to index
    %c0 = arith.constant 0 : index
    %c0_5 = arith.constant 0 : index
    %12 = vector.load %arg2[%11, %c0, %c0_5] : memref<1x8x256xf32, #tpu.memory_space<vmem>>, vector<1x8x256xf32>
    %13 = arith.index_cast %10 : i32 to index
    %c0_6 = arith.constant 0 : index
    %c0_7 = arith.constant 0 : index
    %14 = vector.load %arg3[%13, %c0_6, %c0_7] : memref<1x8x256xf32, #tpu.memory_space<vmem>>, vector<1x8x256xf32>
    %15 = arith.subf %12, %14 : vector<1x8x256xf32>
    %16 = arith.subi %6, %10 : i32
    %17 = vector.broadcast %16 : i32 to vector<1x8x256xi32>
    %18 = arith.cmpi slt, %7, %17 : vector<1x8x256xi32>
    %cst_8 = arith.constant 0.000000e+00 : f32
    %19 = vector.broadcast %cst_8 : f32 to vector<1x8x256xf32>
    %20 = arith.select %18, %15, %19 : vector<1x8x256xi1>, vector<1x8x256xf32>
    %cst_9 = arith.constant dense<0.000000e+00> : vector<8x256xf32>
    %21 = vector.multi_reduction <add>, %20, %cst_9 [0] : vector<1x8x256xf32> to vector<8x256xf32>
    %22 = arith.addf %8, %21 : vector<8x256xf32>
    %c1_i32_10 = arith.constant 1 : i32
    %c0_11 = arith.constant 0 : index
    %c0_12 = arith.constant 0 : index
    %c0_13 = arith.constant 0 : index
    %23 = vector.load %arg4[%c0_11, %c0_12, %c0_13] : memref<1x8x256xf32, #tpu.memory_space<vmem>>, vector<1x8x256xf32>
    %24 = vector.shape_cast %23 : vector<1x8x256xf32> to vector<8x256xf32>
    %25 = arith.addf %24, %22 : vector<8x256xf32>
    %c0_14 = arith.constant 0 : index
    %c0_15 = arith.constant 0 : index
    %c0_16 = arith.constant 0 : index
    %26 = vector.load %arg4[%c0_14, %c0_15, %c0_16] : memref<1x8x256xf32, #tpu.memory_space<vmem>>, vector<1x8x256xf32>
    %27 = vector.shape_cast %26 : vector<1x8x256xf32> to vector<8x256xf32>
    %28 = vector.shape_cast %25 : vector<8x256xf32> to vector<1x8x256xf32>
    tpu.vector_store %arg4[%c0_14, %c0_15, %c0_16], %28 {strides = array<i32>} : memref<1x8x256xf32, #tpu.memory_space<vmem>>, vector<1x8x256xf32>,
    return
  }
  func.func @transform_0(%arg0: i32, %arg1: i32) -> (i32, i32, i32) {
    %c1_i32 = arith.constant 1 : i32
    %0 = arith.muli %arg0, %c1_i32 : i32
    %1 = arith.addi %0, %arg1 : i32
    %c0_i32 = arith.constant 0 : i32
    %2 = arith.minsi %1, %c0_i32 : i32
    %c0_i32_0 = arith.constant 0 : i32
    %c0_i32_1 = arith.constant 0 : i32
    %c0_i32_2 = arith.constant 0 : i32
    return %2, %c0_i32_0, %c0_i32_1 : i32, i32, i32
  }
  func.func @transform_1(%arg0: i32, %arg1: i32) -> (i32, i32, i32) {
    %c1_i32 = arith.constant 1 : i32
    %0 = arith.muli %arg0, %c1_i32 : i32
    %1 = arith.addi %0, %arg1 : i32
    %c0_i32 = arith.constant 0 : i32
    %2 = arith.minsi %1, %c0_i32 : i32
    %c0_i32_0 = arith.constant 0 : i32
    %c0_i32_1 = arith.constant 0 : i32
    %c0_i32_2 = arith.constant 0 : i32
    return %2, %c0_i32_0, %c0_i32_1 : i32, i32, i32
  }
  func.func @transform_2(%arg0: i32, %arg1: i32) -> (i32, i32, i32) {
    %c0_i32 = arith.constant 0 : i32
    %c0_i32_0 = arith.constant 0 : i32
    %c0_i32_1 = arith.constant 0 : i32
    return %arg0, %c0_i32, %c0_i32_0 : i32, i32, i32
  }
}

</mosaic_0001>

<bundles_post_ra>
// kernel: tpu_custom_call.1
= control target key start
LH: loop header
LB: loop body
LE: loop exit
PB: predicated region body
PF: predicated region fallthrough
CT: control target
= control target key end

     0   :  { %7 = vsyncpa [#allocation3], 0  ;;  %s238_s0 = inlined_call_operand.hbm [shape: f32[1,8,256], index: 0, kind: input, shape index: {}]   ;;  %s239_s1 = inlined_call_operand.hbm [shape: f32[1,8,256], index: 1, kind: input, shape index: {}]   ;;  %s240_s2 = inlined_call_operand.hbm [shape: f32[1,8,256], index: 2, kind: output, shape index: {}]  }
   0x1   :  { %8 = vsyncpa [#allocation6], 0 }
   0x2   :  { %9 = vsyncpa [#allocation4], 0  ;;  %s184_s9 = smov [#allocation2]   ;;  %s185_s11 = smov [#allocation5]  }
   0x3   :  { %s22_s10 = sshll.u32 %s184_s9, 4  ;;  %s38_s12 = sshll.u32 %s185_s11, 4  ;;  %s23_s10 = int_to_ptr.vmem [resolvable:$true] %s22_s10  ;;  %s39_s12 = int_to_ptr.vmem [resolvable:$true] %s38_s12 }
   0x4   :  { %s112_s15 = scalar_lea.hbm %s238_s0, 256 }
   0x5   :  { %p113_p0 = scmp.ne.s32.totalorder %s238_s0, %s112_s15  ;;  %p116_p1 = scmp.lt.u32.totalorder %s112_s15, %s238_s0 }
   0x7   :  { %p118_p2 = pnand %p116_p1, %p113_p0 }
   0x9   :  { %121 = shalt.err (!%p118_p2)
}
   0xa   :  { %s122_s20 = scalar_lea.vmem %s23_s10, 256  ;;  %p127_p4 = scmp.lt.s32.totalorder %s23_s10, %s23_s10 }
   0xb   :  { %p123_p3 = scmp.ne.s32.totalorder %s23_s10, %s122_s20  ;;  %p128_p5 = scmp.lt.s32.totalorder %s122_s20, %s122_s20 }
   0xd   :  { %p129_p6 = por %p128_p5, %p127_p4 }
   0xf   :  { %p130_p7 = pnand %p129_p6, %p123_p3 }
  0x11   :  { %133 = shalt.err (!%p130_p7)
}
  0x12   :  { %25 = dma.hbm_to_vmem [thread:$0]  %s238_s0, 256, %s23_s10, [#allocation3]  }
  0x13   :  { %s134_s25 = scalar_lea.hbm %s239_s1, 256 }
  0x14   :  { %p135_p8 = scmp.ne.s32.totalorder %s239_s1, %s134_s25  ;;  %p138_p9 = scmp.lt.u32.totalorder %s134_s25, %s239_s1 }
  0x16   :  { %p140_p10 = pnand %p138_p9, %p135_p8 }
  0x18   :  { %143 = shalt.err (!%p140_p10)
}
  0x19   :  { %s144_s30 = scalar_lea.vmem %s39_s12, 256  ;;  %p149_p12 = scmp.lt.s32.totalorder %s39_s12, %s39_s12 }
  0x1a   :  { %p145_p11 = scmp.ne.s32.totalorder %s39_s12, %s144_s30  ;;  %p150_p13 = scmp.lt.s32.totalorder %s144_s30, %s144_s30 }
  0x1c   :  { %p151_p0 = por %p150_p13, %p149_p12 }
  0x1e   :  { %p152_p1 = pnand %p151_p0, %p145_p11 }
  0x20   :  { %155 = shalt.err (!%p152_p1)
}
  0x21   :  { %41 = dma.hbm_to_vmem [thread:$0]  %s239_s1, 256, %s39_s12, [#allocation6]  }
  0x22   :  { %178 = dma.done.wait [#allocation3], 256  }
  0x23   :  { %179 = vsyncadd [#allocation3], 4294967040 }
  0x24   :  { %180 = dma.done.wait [#allocation6], 256  }
  0x25   :  { %181 = vsyncadd [#allocation6], 4294967040  ;;  %v65_v0 = vld [vmem:[#allocation2] sm:$0xff]  ;;  %v69_v1 = vld [vmem:[#allocation5] sm:$0xff]  ;;  %s186_s4 = smov [#allocation7]  }
  0x26   :  { %v66_v2 = vld [vmem:[#allocation2 + $0x8] sm:$0xff]  ;;  %v71_v3 = vsub.f32 %v65_v0, %v69_v1  ;;  %v70_v4 = vld [vmem:[#allocation5 + $0x8] sm:$0xff]  ;;  %s94_s5 = sshll.u32 %s186_s4, 4  ;;  %s95_s5 = int_to_ptr.vmem [resolvable:$true] %s94_s5 }
  0x27   :  { %v72_v5 = vsub.f32 %v66_v2, %v70_v4  ;;  %s156_s6 = scalar_lea.vmem %s95_s5, 256  ;;  %p161_p3 = scmp.lt.s32.totalorder %s95_s5, %s95_s5 }
  0x28   :  { %86 = vst [vmem:[#allocation7] sm:$0xff] %v71_v3  ;;  %p157_p2 = scmp.ne.s32.totalorder %s95_s5, %s156_s6  ;;  %p162_p4 = scmp.lt.s32.totalorder %s156_s6, %s156_s6 }
  0x29   :  { %87 = vst [vmem:[#allocation7 + $0x8] sm:$0xff] %v72_v5 }
  0x2a   :  { %p163_p5 = por %p162_p4, %p161_p3 }
  0x2c   :  { %p164_p6 = pnand %p163_p5, %p157_p2 }
  0x2e   :  { %167 = shalt.err (!%p164_p6)
}
  0x2f   :  { %s168_s8 = scalar_lea.hbm %s240_s2, 256 }
  0x30   :  { %p169_p7 = scmp.ne.s32.totalorder %s240_s2, %s168_s8  ;;  %p172_p8 = scmp.lt.u32.totalorder %s168_s8, %s240_s2 }
  0x32   :  { %p174_p9 = pnand %p172_p8, %p169_p7 }
  0x34   :  { %177 = shalt.err (!%p174_p9)
}
  0x35   :  { %97 = dma.vmem_to_hbm [thread:$0]  %s95_s5, 256, %s240_s2, [#allocation4]  }
  0x36   :  { %182 = dma.done.wait [#allocation4], 256  }
  0x37   :  { %183 = vsyncadd [#allocation4], 4294967040 }
  0x38   :  { %101 = vsyncpa [#allocation3], 1 }
  0x39   :  { %102 = vsyncpa [#allocation6], 1 }
  0x3a   :  { %103 = vsyncpa [#allocation4], 1 }

</bundles_post_ra>
